<compile_context>
chip_gen: v5e
topology: v5e:2x2
jax: 0.10.0
libtpu: 0.0.40
codegen_flags: <defaults>
</compile_context>

<pallas_src>
import functools

import jax
import jax.numpy as jnp
from jax.experimental import pallas as pl
from jax.experimental.pallas import tpu as pltpu

GAMMA = 2.0


def _round_up(x: int, m: int) -> int:
    return (x + m - 1) // m * m


def _vmem_budgets():
    """Returns (f32-footprint budget per logits block, scoped-vmem-limit cap)."""
    try:
        vmem_cap = int(pltpu.get_tpu_info().vmem_capacity_bytes)
    except Exception:
        vmem_cap = 64 << 20  # conservative fallback: assume v7x-sized VMEM
    if vmem_cap > (96 << 20):
        # v5e / v6e: 128 MiB physical VMEM per TensorCore -> big blocks are fine.
        return 16 << 20, 96 << 20
    # v7x-class: 64 MiB per TensorCore -> leave headroom for Mosaic scratch.
    return 8 << 20, 40 << 20


def _choose_tile_n(n: int, c: int, row_align: int, f32_block_budget: int) -> int:
    """Byte-sized row tiles: MiB-range blocks, but >= ~8 grid steps when N allows."""
    row_f32_bytes = max(1, c * 4)
    tile = max(1, f32_block_budget // row_f32_bytes)
    # Keep at least ~8 tiles so dimension_semantics=('parallel',) can load-balance
    # the batch axis across v7x's 2 TensorCores (no-op on single-TC v5e/v6e).
    tile = min(tile, pl.cdiv(max(n, 1), 8))
    tile = max(tile, row_align)
    return _round_up(tile, row_align)


def focal_loss_kernel(n_ref, logits_ref, target_ref, out_ref, *, gamma: float):
    i = pl.program_id(0)
    n_valid = n_ref[0]                                   # scalar-prefetch SMEM arg

    logits = logits_ref[...].astype(jnp.float32)         # (TILE_N, C), f32 compute
    tgt = target_ref[...]                                # (TILE_N, 1) int32
    tn, c = logits.shape

    # Target logit via lane-iota compare + masked sum (no one-hot temporary).
    col_idx = jax.lax.broadcasted_iota(jnp.int32, (tn, c), 1)
    tgt_logit = jnp.sum(jnp.where(col_idx == tgt, logits, 0.0),
                        axis=-1, keepdims=True)          # (TILE_N, 1)

    # Numerically stable log-sum-exp over the class (lane) axis.
    m = jnp.max(logits, axis=-1, keepdims=True)
    lse = m + jnp.log(jnp.sum(jnp.exp(logits - m), axis=-1, keepdims=True))

    ce = lse - tgt_logit                                 # per-sample CE, (TILE_N, 1)
    pt = jnp.exp(-ce)
    d = jnp.maximum(1.0 - pt, 0.0)                       # clamp: no NaN when ce ~ 0
    if gamma == 2.0:
        w = d * d                                        # plain VPU multiply, no pow
    elif float(gamma).is_integer() and gamma >= 0:
        w = d ** int(gamma)
    else:
        w = jnp.power(jnp.maximum(d, jnp.float32(1e-30)), jnp.float32(gamma))
    focal = w * ce                                       # (TILE_N, 1)

    # Select (not multiply) so NaN/Inf in garbage rows of the last partial block
    # can never leak.  OOB writes of the partial block are dropped by Pallas.
    row_idx = i * tn + jax.lax.broadcasted_iota(jnp.int32, (tn, 1), 0)
    out_ref[...] = jnp.where(row_idx < n_valid, focal, 0.0)


def focal_loss(logits: jax.Array, targets: jax.Array, gamma: float = GAMMA) -> jax.Array:
    """Pallas focal loss.  logits: (N, C) float (f32 or bf16), targets: (N,) int class ids."""
    n, c = logits.shape
    itemsize = jnp.dtype(logits.dtype).itemsize
    row_align = 16 if itemsize < 4 else 8                # bf16 (16,128) sublane packing

    f32_budget, vmem_limit_cap = _vmem_budgets()
    tile_n = _choose_tile_n(n, c, row_align, f32_budget)
    grid = pl.cdiv(n, tile_n)

    targets_2d = targets.astype(jnp.int32).reshape(n, 1)
    n_valid = jnp.full((1,), n, dtype=jnp.int32)         # SMEM scalar-prefetch arg

    # 2x-buffered input block + headroom for in-kernel f32 temporaries.
    in_block_bytes = tile_n * c * itemsize
    f32_block_bytes = tile_n * c * 4
    vmem_limit = 2 * in_block_bytes + 4 * f32_block_bytes + (4 << 20)
    vmem_limit = max(vmem_limit, 16 << 20)
    vmem_limit = min(vmem_limit, vmem_limit_cap)

    per_row = pl.pallas_call(
        functools.partial(focal_loss_kernel, gamma=gamma),
        out_shape=jax.ShapeDtypeStruct((n, 1), jnp.float32),
        grid_spec=pltpu.PrefetchScalarGridSpec(
            num_scalar_prefetch=1,
            grid=(grid,),
            in_specs=[
                pl.BlockSpec((tile_n, c), lambda i, n_ref: (i, 0)),
                pl.BlockSpec((tile_n, 1), lambda i, n_ref: (i, 0)),
            ],
            out_specs=pl.BlockSpec((tile_n, 1), lambda i, n_ref: (i, 0)),
        ),
        compiler_params=pltpu.CompilerParams(
            dimension_semantics=("parallel",),
            vmem_limit_bytes=int(vmem_limit),
        ),
    )(n_valid, logits, targets_2d)

    # Cheap final mean over the true batch in the wrapper (N f32 values).
    return jnp.sum(per_row) / jnp.float32(n)


def focal_loss_ref(logits, targets, gamma=GAMMA):
    """Pure-JAX reference (mirrors torch.nn.CrossEntropyLoss + focal weighting)."""
    logits = logits.astype(jnp.float32)
    lse = jax.nn.logsumexp(logits, axis=-1)
    tgt_logit = jnp.take_along_axis(logits, targets[:, None].astype(jnp.int32), axis=-1)[:, 0]
    ce = lse - tgt_logit
    pt = jnp.exp(-ce)
    return jnp.mean((1.0 - pt) ** gamma * ce)


if __name__ == "__main__":
    key = jax.random.PRNGKey(0)
    k1, k2, k3, k4, k5, k6 = jax.random.split(key, 6)

    # Small shapes implied by the forward: (batch, num_classes) logits + int targets.
    N, C = 8, 32
    logits = jax.random.normal(k1, (N, C), dtype=jnp.float32)
    targets = jax.random.randint(k2, (N,), 0, C, dtype=jnp.int32)
    loss = focal_loss(logits, targets)
    jax.block_until_ready(loss)
    ref = focal_loss_ref(logits, targets)
    assert jnp.allclose(loss, ref, atol=1e-5, rtol=1e-5), (loss, ref)

    # Non-multiple batch size exercises the partial-last-block masking path
    # (no wrapper-side padding any more).
    N2, C2 = 13, 40
    logits2 = jax.random.normal(k3, (N2, C2), dtype=jnp.float32)
    targets2 = jax.random.randint(k4, (N2,), 0, C2, dtype=jnp.int32)
    loss2 = focal_loss(logits2, targets2)
    jax.block_until_ready(loss2)
    ref2 = focal_loss_ref(logits2, targets2)
    assert jnp.allclose(loss2, ref2, atol=1e-5, rtol=1e-5), (loss2, ref2)

    # bf16 logits path: half the HBM read traffic; kernel upcasts to f32.
    N3, C3 = 40, 128
    logits3 = jax.random.normal(k5, (N3, C3), dtype=jnp.float32).astype(jnp.bfloat16)
    targets3 = jax.random.randint(k6, (N3,), 0, C3, dtype=jnp.int32)
    loss3 = focal_loss(logits3, targets3)
    jax.block_until_ready(loss3)
    ref3 = focal_loss_ref(logits3, targets3)
    assert jnp.allclose(loss3, ref3, atol=1e-4, rtol=1e-4), (loss3, ref3)

    print("KERNEL_OK")
</pallas_src>

<mosaic_0001>
module attributes {stable_mosaic.version = 11 : i64} {
  func.func @focal_loss_kernel(%arg0: i32, %arg1: memref<1xi32, #tpu.memory_space<smem>>, %arg2: memref<8x32xf32, #tpu.memory_space<vmem>>, %arg3: memref<8x1xi32, #tpu.memory_space<vmem>>, %arg4: memref<8x1xf32, #tpu.memory_space<vmem>>) attributes {dimension_semantics = [#tpu.dimension_semantics<parallel>], iteration_bounds = array<i64: 1>, scalar_prefetch = 1 : i64, scratch_operands = 0 : i64, tpu.core_type = #tpu.core_type<tc>, window_params = [{transform_indices = @transform_0, window_bounds = array<i64: 8, 32>}, {transform_indices = @transform_1, window_bounds = array<i64: 8, 1>}, {transform_indices = @transform_2, window_bounds = array<i64: 8, 1>}]} {
    %c0 = arith.constant 0 : index
    %0 = memref.load %arg1[%c0] : memref<1xi32, #tpu.memory_space<smem>>
    %c0_0 = arith.constant 0 : index
    %c0_1 = arith.constant 0 : index
    %1 = vector.load %arg2[%c0_0, %c0_1] : memref<8x32xf32, #tpu.memory_space<vmem>>, vector<8x32xf32>
    %c0_2 = arith.constant 0 : index
    %c0_3 = arith.constant 0 : index
    %2 = vector.load %arg3[%c0_2, %c0_3] : memref<8x1xi32, #tpu.memory_space<vmem>>, vector<8x1xi32>
    %3 = tpu.iota {dimensions = array<i32: 1>} : vector<8x32xi32>
    %4 = vector.broadcast %2 : vector<8x1xi32> to vector<8x32xi32>
    %5 = arith.cmpi eq, %3, %4 : vector<8x32xi32>
    %cst = arith.constant 0.000000e+00 : f32
    %6 = vector.broadcast %cst : f32 to vector<8x32xf32>
    %7 = arith.select %5, %1, %6 : vector<8x32xi1>, vector<8x32xf32>
    %cst_4 = arith.constant dense<0.000000e+00> : vector<8xf32>
    %8 = vector.multi_reduction <add>, %7, %cst_4 [1] : vector<8x32xf32> to vector<8xf32>
    %9 = vector.shape_cast %8 : vector<8xf32> to vector<8x1xf32>
    %cst_5 = arith.constant dense<0xFF800000> : vector<8xf32>
    %10 = vector.multi_reduction <maximumf>, %1, %cst_5 [1] : vector<8x32xf32> to vector<8xf32>
    %11 = vector.shape_cast %10 : vector<8xf32> to vector<8x1xf32>
    %12 = vector.broadcast %11 : vector<8x1xf32> to vector<8x32xf32>
    %13 = arith.subf %1, %12 : vector<8x32xf32>
    %14 = math.exp %13 : vector<8x32xf32>
    %cst_6 = arith.constant dense<0.000000e+00> : vector<8xf32>
    %15 = vector.multi_reduction <add>, %14, %cst_6 [1] : vector<8x32xf32> to vector<8xf32>
    %16 = vector.shape_cast %15 : vector<8xf32> to vector<8x1xf32>
    %17 = math.log %16 : vector<8x1xf32>
    %18 = arith.addf %11, %17 : vector<8x1xf32>
    %19 = arith.subf %18, %9 : vector<8x1xf32>
    %cst_7 = arith.constant 0.000000e+00 : f32
    %20 = vector.broadcast %cst_7 : f32 to vector<8x1xf32>
    %21 = arith.subf %20, %19 : vector<8x1xf32>
    %22 = math.exp %21 : vector<8x1xf32>
    %cst_8 = arith.constant 1.000000e+00 : f32
    %23 = vector.broadcast %cst_8 : f32 to vector<8x1xf32>
    %24 = arith.subf %23, %22 : vector<8x1xf32>
    %cst_9 = arith.constant 0.000000e+00 : f32
    %25 = vector.broadcast %cst_9 : f32 to vector<8x1xf32>
    %26 = arith.maximumf %24, %25 : vector<8x1xf32>
    %27 = arith.mulf %26, %26 : vector<8x1xf32>
    %28 = arith.mulf %27, %19 : vector<8x1xf32>
    %c8_i32 = arith.constant 8 : i32
    %29 = arith.muli %arg0, %c8_i32 : i32
    %30 = tpu.iota {dimensions = array<i32: 0>} : vector<8x1xi32>
    %31 = vector.broadcast %29 : i32 to vector<8x1xi32>
    %32 = arith.addi %31, %30 : vector<8x1xi32>
    %33 = vector.broadcast %0 : i32 to vector<8x1xi32>
    %34 = arith.cmpi slt, %32, %33 : vector<8x1xi32>
    %cst_10 = arith.constant 0.000000e+00 : f32
    %35 = vector.broadcast %cst_10 : f32 to vector<8x1xf32>
    %36 = arith.select %34, %28, %35 : vector<8x1xi1>, vector<8x1xf32>
    %c0_11 = arith.constant 0 : index
    %c0_12 = arith.constant 0 : index
    %37 = vector.load %arg4[%c0_11, %c0_12] : memref<8x1xf32, #tpu.memory_space<vmem>>, vector<8x1xf32>
    tpu.vector_store %arg4[%c0_11, %c0_12], %36 {strides = array<i32>} : memref<8x1xf32, #tpu.memory_space<vmem>>, vector<8x1xf32>,
    return
  }
  func.func @transform_0(%arg0: i32, %arg1: memref<1xi32, #tpu.memory_space<smem>>) -> (i32, i32) {
    %c0_i32 = arith.constant 0 : i32
    %c0_i32_0 = arith.constant 0 : i32
    return %arg0, %c0_i32 : i32, i32
  }
  func.func @transform_1(%arg0: i32, %arg1: memref<1xi32, #tpu.memory_space<smem>>) -> (i32, i32) {
    %c0_i32 = arith.constant 0 : i32
    %c0_i32_0 = arith.constant 0 : i32
    return %arg0, %c0_i32 : i32, i32
  }
  func.func @transform_2(%arg0: i32, %arg1: memref<1xi32, #tpu.memory_space<smem>>) -> (i32, i32) {
    %c0_i32 = arith.constant 0 : i32
    %c0_i32_0 = arith.constant 0 : i32
    return %arg0, %c0_i32 : i32, i32
  }
}

</mosaic_0001>

<bundles_post_ra>
// kernel: tpu_custom_call.1
= control target key start
LH: loop header
LB: loop body
LE: loop exit
PB: predicated region body
PF: predicated region fallthrough
CT: control target
= control target key end

     0   :  { %vm23_vm0 = vcmask 261120   ;;  %v69_v1 = vmov 0   ;;  %v16_v9 = vlaneseq  ;;  %vm55_vm3 = vcmask 7168   ;;  %s105_s1 = inlined_call_operand.vmem [shape: f32[8,32], index: 1, kind: input, shape index: {}]   ;;  %s106_s2 = inlined_call_operand.vmem [shape: s32[8,1], index: 2, kind: input, shape index: {}]   ;;  %s107_s0 = inlined_call_operand.<no memory space> [shape: s32[1], index: 0, kind: input, shape index: {}]   ;;  %s108_s3 = inlined_call_operand.vmem [shape: f32[8,1], index: 3, kind: output, shape index: {}]  }
   0x1   :  { %v14_v0 = vld [vmem:[%s105_s1] sm:$0xff]  ;;  %62 = vset.pattern.permute.xlu0 %v69_v1  ;;  %v52_v26 = vstv %s107_s0 }
   0x2   :  { %v27_v2 = vsel %vm23_vm0, %v14_v0, -inf  ;;  %v15_v3 = vld [vmem:[%s106_s2] sm:$0xff]  ;;  %v17_v10 = vand.u32 127, %v16_v9  ;;  %v49_v24 = vshrl.u32 %v16_v9, 7 }
   0x3   :  { %28 = vmax.xlane.f32.xlu0 %v27_v2 }
   0x4   :  { %vm53_vm2 = vcmp.lt.s32.totalorder %v49_v24, %v52_v26 }
  0x17   :  { %19 = vperm.xlu0 %62, %v15_v3  }
  0x76   :  { %v29_v4 = vpop.xlane.xlu0 %28 }
  0x77   :  { %v30_v5 = vsub.f32 %v14_v0, %v29_v4 }
  0x79   :  { %v31_v6 = vmul.f32 1.442695, %v30_v5 }
  0x7b   :  { %63 = vpow2.f32 %v31_v6 }
  0x81   :  { %v64_v7 = vpop.eup %63 }
  0x82   :  { %v33_v8 = vsel %vm23_vm0, %v64_v7, 0.0 }
  0x83   :  { %34 = vadd.xlane.f32.xlu1 %v33_v8 }
  0x89   :  { %v20_v11 = vpop.permute.xlu0 %19 }
  0x8a   :  { %vm21_vm1 = vcmp.eq.s32.totalorder %v17_v10, %v20_v11 }
  0x8b   :  { %v22_v12 = vsel %vm21_vm1, %v14_v0, 0.0 }
  0x8c   :  { %v24_v13 = vsel %vm23_vm0, %v22_v12, 0.0 }
  0x8d   :  { %25 = vadd.xlane.f32.xlu1 %v24_v13 }
  0xf6   :  { %v35_v14 = vpop.xlane.xlu1 %34 }
  0xf7   :  { %65 = vlog2.f32 %v35_v14 }
  0xfd   :  { %v66_v15 = vpop.eup %65 }
  0xfe   :  { %v37_v16 = vmul.f32 0.6931472, %v66_v15 }
 0x100   :  { %v38_v17 = vadd.f32 %v37_v16, %v29_v4  ;;  %v26_v18 = vpop.xlane.xlu1 %25 }
 0x102   :  { %v39_v19 = vsub.f32 %v38_v17, %v26_v18 }
 0x104   :  { %v40_v20 = vsub.f32 0.0, %v39_v19 }
 0x106   :  { %v41_v21 = vmul.f32 1.442695, %v40_v20 }
 0x108   :  { %67 = vpow2.f32 %v41_v21 }
 0x10e   :  { %v68_v22 = vpop.eup %67 }
 0x10f   :  { %v43_v23 = vsub.f32 1.0, %v68_v22 }
 0x111   :  { %v44_v25 = vmax.f32 %v43_v23, 0.0 }
 0x113   :  { %v45_v27 = vmul.f32 %v44_v25, %v44_v25 }
 0x115   :  { %v46_v28 = vmul.f32 %v45_v27, %v39_v19 }
 0x117   :  { %v54_v29 = vsel %vm53_vm2, %v46_v28, 0.0 }
 0x118   :  { %56 = vst.msk [vmem:[%s108_s3] sm:$0xff] %vm55_vm3, %v54_v29 }

</bundles_post_ra>
